<compile_context>
chip_gen: v7x
topology: tpu7x:2x2x1
jax: 0.10.0
libtpu: 0.0.40
codegen_flags: <defaults>
</compile_context>

<pallas_src>
import functools

import jax
import jax.numpy as jnp
from jax import lax
from jax.experimental import pallas as pl
from jax.experimental.pallas import tpu as pltpu

_BN_EPS = 1e-5
_LANE = 128


def _round_up(x, m):
    return ((x + m - 1) // m) * m


def _vmem_spec():
    return pl.BlockSpec(memory_space=pltpu.MemorySpace.VMEM)


# -----------------------------------------------------------------------------
# Kernel 1: fused [Linear(no bias) -> BatchNorm1d(batch stats) -> ReLU] stack.
# The whole batch lives in one block so BN statistics are exact batch stats.
# NOTE: the batch dimension must never be tiled here, or BN stats would change.
# -----------------------------------------------------------------------------
def _make_hidden_stack_kernel(num_hidden):
    def kernel(*refs):
        # refs layout: x, (w_t, gamma, beta) * num_hidden, h_out
        x_ref = refs[0]
        h_out_ref = refs[-1]
        h = x_ref[...].astype(jnp.float32)
        idx = 1
        for _ in range(num_hidden):
            w_ref, g_ref, b_ref = refs[idx], refs[idx + 1], refs[idx + 2]
            idx += 3
            # Linear (bf16 MXU inputs, f32 accumulate)
            h = jnp.dot(h.astype(jnp.bfloat16), w_ref[...],
                        preferred_element_type=jnp.float32)
            # BatchNorm1d (training-mode batch stats, biased var) folded into a
            # single scale/shift FMA, ReLU fused into the same pass.
            mu = jnp.mean(h, axis=0, keepdims=True)
            var = jnp.maximum(
                jnp.mean(h * h, axis=0, keepdims=True) - mu * mu, 0.0)
            scale = g_ref[...] * lax.rsqrt(var + _BN_EPS)   # EUP rsqrt
            shift = b_ref[...] - mu * scale
            h = jnp.maximum(h * scale + shift, 0.0)
        h_out_ref[...] = h.astype(h_out_ref.dtype)

    return kernel


# -----------------------------------------------------------------------------
# Kernel 2: final Linear, tiled over the (padded) classes dimension.
# Weight tiles stream HBM->VMEM (double-buffered via BlockSpec); the bias is
# added per tile so each lane-dense output tile is written exactly once.
# -----------------------------------------------------------------------------
def _final_linear_kernel(h_ref, w_ref, b_ref, out_ref):
    acc = jnp.dot(h_ref[...].astype(jnp.bfloat16), w_ref[...],
                  preferred_element_type=jnp.float32)
    out_ref[...] = (acc + b_ref[...]).astype(out_ref.dtype)


class ClassifierPallas:
    """JAX/Pallas re-implementation of the PyTorch Classifier module."""

    def __init__(self, embedding_size, classes, head_hidden=None, bn_mom=0.05,
                 key=None, max_class_tile=1024):
        del bn_mom  # only affects running-stat updates, not the forward output
        if key is None:
            key = jax.random.PRNGKey(0)
        self.embedding_size = embedding_size
        self.classes = classes
        self.head_hidden = None if head_hidden is None else list(head_hidden)
        self.num_hidden = 0 if head_hidden is None else len(head_hidden)

        # Padded (lane-dense) dimensions.
        self.e_pad = _round_up(embedding_size, _LANE)
        if self.num_hidden:
            self.h_pads = [_round_up(h, _LANE) for h in head_hidden]
            k_in, self.k_pad = head_hidden[-1], self.h_pads[-1]
        else:
            self.h_pads = []
            k_in, self.k_pad = embedding_size, self.e_pad

        # Class tile: multiple of 128, padded classes divide evenly by it.
        self.tn = min(_round_up(classes, _LANE), max_class_tile)
        self.c_pad = _round_up(classes, self.tn)

        def linear_init(k, out_f, in_f, with_bias):
            # deterministic stand-in for torch's kaiming-uniform init
            kw, kb = jax.random.split(k)
            bound = 1.0 / float(in_f) ** 0.5
            w = jax.random.uniform(kw, (out_f, in_f), jnp.float32, -bound, bound)
            b = (jax.random.uniform(kb, (1, out_f), jnp.float32, -bound, bound)
                 if with_bias else None)
            return w, b

        # Hidden (Linear -> BN -> ReLU) parameters, padded + bf16 weights.
        self.hidden_params = []
        if self.num_hidden:
            in_sizes = [embedding_size] + list(head_hidden)
            in_pads = [self.e_pad] + self.h_pads
            for li, (in_f, out_f) in enumerate(zip(in_sizes, head_hidden)):
                key, k = jax.random.split(key)
                w, _ = linear_init(k, out_f, in_f, False)
                in_p, out_p = in_pads[li], self.h_pads[li]
                w_t = jnp.zeros((in_p, out_p), jnp.float32)
                w_t = w_t.at[:in_f, :out_f].set(w.T)
                gamma = jnp.ones((1, out_p), jnp.float32)
                beta = jnp.zeros((1, out_p), jnp.float32)  # pad beta = 0 keeps pad cols 0
                self.hidden_params.append((w_t.astype(jnp.bfloat16), gamma, beta))

        # Final Linear parameters (padded, bf16 weights, f32 bias).
        key, k = jax.random.split(key)
        w, b = linear_init(k, classes, k_in, True)
        w_out_t = jnp.zeros((self.k_pad, self.c_pad), jnp.float32)
        w_out_t = w_out_t.at[:k_in, :classes].set(w.T)
        self.w_out_t = w_out_t.astype(jnp.bfloat16)
        self.b_out = jnp.zeros((1, self.c_pad), jnp.float32).at[:, :classes].set(b)

        self._hidden_kernel = (_make_hidden_stack_kernel(self.num_hidden)
                               if self.num_hidden else None)

    # ----- VMEM budget for the gridded final matmul (safe for v7x's 64 MiB) ---
    def _final_vmem_limit(self, batch):
        b8 = _round_up(max(batch, 8), 8)
        est = (2 * b8 * self.k_pad * 4          # resident activations (dbl-buffered)
               + 2 * self.k_pad * self.tn * 2   # bf16 weight tiles, dbl-buffered
               + 2 * 8 * self.tn * 4            # bias tiles (sublane-padded)
               + 2 * b8 * self.tn * 4)          # output tiles
        return int(min(max(32 * 1024 * 1024, 2 * est), 48 * 1024 * 1024))

    @functools.partial(jax.jit, static_argnums=0)
    def __call__(self, embeddings):
        batch = embeddings.shape[0]
        x = embeddings.astype(jnp.float32)
        if self.e_pad != self.embedding_size:
            x = jnp.pad(x, ((0, 0), (0, self.e_pad - self.embedding_size)))

        # --- hidden stack (whole batch, fully VMEM-resident, fused) ----------
        if self.num_hidden:
            flat = [p for layer in self.hidden_params for p in layer]
            h = pl.pallas_call(
                self._hidden_kernel,
                out_shape=jax.ShapeDtypeStruct((batch, self.k_pad), jnp.float32),
                in_specs=[_vmem_spec()] * (1 + len(flat)),
                out_specs=_vmem_spec(),
            )(x, *flat)
        else:
            h = x

        # --- final Linear: grid over lane-dense class tiles ------------------
        k_pad, tn = self.k_pad, self.tn
        grid = (self.c_pad // tn,)
        out_padded = pl.pallas_call(
            _final_linear_kernel,
            out_shape=jax.ShapeDtypeStruct((batch, self.c_pad), jnp.float32),
            grid=grid,
            in_specs=[
                pl.BlockSpec((batch, k_pad), lambda j: (0, 0)),   # resident acts
                pl.BlockSpec((k_pad, tn), lambda j: (0, j)),      # streamed weights
                pl.BlockSpec((1, tn), lambda j: (0, j)),          # bias tile
            ],
            out_specs=pl.BlockSpec((batch, tn), lambda j: (0, j)),
            compiler_params=pltpu.CompilerParams(
                dimension_semantics=("parallel",),                # v7x: 2 TCs split tiles
                vmem_limit_bytes=self._final_vmem_limit(batch),
            ),
        )(h, self.w_out_t, self.b_out)

        return out_padded[:, :self.classes]

    # pure-JAX reference (same math / same bf16 weights) for verification
    def reference(self, embeddings):
        x = embeddings.astype(jnp.float32)
        if self.e_pad != self.embedding_size:
            x = jnp.pad(x, ((0, 0), (0, self.e_pad - self.embedding_size)))
        h = x
        for w_t, gamma, beta in self.hidden_params:
            h = jnp.dot(h.astype(jnp.bfloat16), w_t,
                        preferred_element_type=jnp.float32)
            mu = jnp.mean(h, axis=0, keepdims=True)
            var = jnp.maximum(jnp.mean(h * h, axis=0, keepdims=True) - mu * mu, 0.0)
            scale = gamma * lax.rsqrt(var + _BN_EPS)
            shift = beta - mu * scale
            h = jnp.maximum(h * scale + shift, 0.0)
        out = jnp.dot(h.astype(jnp.bfloat16), self.w_out_t,
                      preferred_element_type=jnp.float32) + self.b_out
        return out[:, :self.classes]


if __name__ == "__main__":
    key = jax.random.PRNGKey(0)
    kx, kp1, kp2, kx3, kp3 = jax.random.split(key, 5)

    # Case 1: MLP head (Linear -> BN -> ReLU stack + final Linear)
    batch, embedding_size, classes = 8, 32, 10
    x = jax.random.normal(kx, (batch, embedding_size), jnp.float32)
    clf_mlp = ClassifierPallas(embedding_size, classes, head_hidden=[32, 32],
                               bn_mom=0.05, key=kp1)
    out_mlp = jax.block_until_ready(clf_mlp(x))
    ref_mlp = clf_mlp.reference(x)
    assert out_mlp.shape == (batch, classes)
    assert jnp.allclose(out_mlp, ref_mlp, atol=5e-3, rtol=5e-3), (
        float(jnp.max(jnp.abs(out_mlp - ref_mlp))))

    # Case 2: plain single-Linear head (head_hidden=None)
    clf_lin = ClassifierPallas(embedding_size, classes, head_hidden=None,
                               bn_mom=0.05, key=kp2)
    out_lin = jax.block_until_ready(clf_lin(x))
    ref_lin = clf_lin.reference(x)
    assert out_lin.shape == (batch, classes)
    assert jnp.allclose(out_lin, ref_lin, atol=5e-3, rtol=5e-3)

    # Case 3: exercise the class-tiled streaming path (grid > 1, parallel axis)
    batch3, emb3, classes3 = 16, 64, 1000
    x3 = jax.random.normal(kx3, (batch3, emb3), jnp.float32)
    clf_big = ClassifierPallas(emb3, classes3, head_hidden=[64],
                               bn_mom=0.05, key=kp3, max_class_tile=256)
    out_big = jax.block_until_ready(clf_big(x3))
    ref_big = clf_big.reference(x3)
    assert out_big.shape == (batch3, classes3)
    assert jnp.allclose(out_big, ref_big, atol=5e-3, rtol=5e-3), (
        float(jnp.max(jnp.abs(out_big - ref_big))))

    print("KERNEL_OK")
</pallas_src>

<mosaic_0001>
module attributes {stable_mosaic.version = 11 : i64} {
  func.func @kernel(%arg0: memref<8x128xf32, #tpu.memory_space<vmem>>, %arg1: memref<128x128xbf16, #tpu.memory_space<vmem>>, %arg2: memref<1x128xf32, #tpu.memory_space<vmem>>, %arg3: memref<1x128xf32, #tpu.memory_space<vmem>>, %arg4: memref<128x128xbf16, #tpu.memory_space<vmem>>, %arg5: memref<1x128xf32, #tpu.memory_space<vmem>>, %arg6: memref<1x128xf32, #tpu.memory_space<vmem>>, %arg7: memref<8x128xf32, #tpu.memory_space<vmem>>) attributes {dimension_semantics = [], scalar_prefetch = 0 : i64, scratch_operands = 0 : i64, tpu.core_type = #tpu.core_type<tc>} {
    %c0 = arith.constant 0 : index
    %c0_0 = arith.constant 0 : index
    %0 = vector.load %arg0[%c0, %c0_0] : memref<8x128xf32, #tpu.memory_space<vmem>>, vector<8x128xf32>
    %1 = arith.truncf %0 : vector<8x128xf32> to vector<8x128xbf16>
    %c0_1 = arith.constant 0 : index
    %c0_2 = arith.constant 0 : index
    %2 = vector.load %arg1[%c0_1, %c0_2] : memref<128x128xbf16, #tpu.memory_space<vmem>>, vector<128x128xbf16>
    %cst = arith.constant dense<0.000000e+00> : vector<8x128xf32>
    %3 = tpu.matmul %1, %2, %cst {dimension_numbers = #tpu.dot_dimension_numbers<[1], [0], [0], [1], [0, 0, 1, 1], [], []>} : vector<8x128xbf16>, vector<128x128xbf16>, vector<8x128xf32> -> vector<8x128xf32>
    %cst_3 = arith.constant dense<0.000000e+00> : vector<128xf32>
    %4 = vector.multi_reduction <add>, %3, %cst_3 [0] : vector<8x128xf32> to vector<128xf32>
    %5 = vector.shape_cast %4 : vector<128xf32> to vector<1x128xf32>
    %cst_4 = arith.constant 8.000000e+00 : f32
    %6 = vector.broadcast %cst_4 : f32 to vector<1x128xf32>
    %7 = arith.divf %5, %6 : vector<1x128xf32>
    %8 = arith.mulf %3, %3 : vector<8x128xf32>
    %cst_5 = arith.constant dense<0.000000e+00> : vector<128xf32>
    %9 = vector.multi_reduction <add>, %8, %cst_5 [0] : vector<8x128xf32> to vector<128xf32>
    %10 = vector.shape_cast %9 : vector<128xf32> to vector<1x128xf32>
    %cst_6 = arith.constant 8.000000e+00 : f32
    %11 = vector.broadcast %cst_6 : f32 to vector<1x128xf32>
    %12 = arith.divf %10, %11 : vector<1x128xf32>
    %13 = arith.mulf %7, %7 : vector<1x128xf32>
    %14 = arith.subf %12, %13 : vector<1x128xf32>
    %cst_7 = arith.constant 0.000000e+00 : f32
    %15 = vector.broadcast %cst_7 : f32 to vector<1x128xf32>
    %16 = arith.maximumf %14, %15 : vector<1x128xf32>
    %c0_8 = arith.constant 0 : index
    %c0_9 = arith.constant 0 : index
    %17 = vector.load %arg2[%c0_8, %c0_9] : memref<1x128xf32, #tpu.memory_space<vmem>>, vector<1x128xf32>
    %cst_10 = arith.constant 9.99999974E-6 : f32
    %18 = vector.broadcast %cst_10 : f32 to vector<1x128xf32>
    %19 = arith.addf %16, %18 : vector<1x128xf32>
    %20 = math.rsqrt %19 : vector<1x128xf32>
    %21 = arith.mulf %17, %20 : vector<1x128xf32>
    %c0_11 = arith.constant 0 : index
    %c0_12 = arith.constant 0 : index
    %22 = vector.load %arg3[%c0_11, %c0_12] : memref<1x128xf32, #tpu.memory_space<vmem>>, vector<1x128xf32>
    %23 = arith.mulf %7, %21 : vector<1x128xf32>
    %24 = arith.subf %22, %23 : vector<1x128xf32>
    %25 = vector.broadcast %21 : vector<1x128xf32> to vector<8x128xf32>
    %26 = arith.mulf %3, %25 : vector<8x128xf32>
    %27 = vector.broadcast %24 : vector<1x128xf32> to vector<8x128xf32>
    %28 = arith.addf %26, %27 : vector<8x128xf32>
    %cst_13 = arith.constant 0.000000e+00 : f32
    %29 = vector.broadcast %cst_13 : f32 to vector<8x128xf32>
    %30 = arith.maximumf %28, %29 : vector<8x128xf32>
    %31 = arith.truncf %30 : vector<8x128xf32> to vector<8x128xbf16>
    %c0_14 = arith.constant 0 : index
    %c0_15 = arith.constant 0 : index
    %32 = vector.load %arg4[%c0_14, %c0_15] : memref<128x128xbf16, #tpu.memory_space<vmem>>, vector<128x128xbf16>
    %cst_16 = arith.constant dense<0.000000e+00> : vector<8x128xf32>
    %33 = tpu.matmul %31, %32, %cst_16 {dimension_numbers = #tpu.dot_dimension_numbers<[1], [0], [0], [1], [0, 0, 1, 1], [], []>} : vector<8x128xbf16>, vector<128x128xbf16>, vector<8x128xf32> -> vector<8x128xf32>
    %cst_17 = arith.constant dense<0.000000e+00> : vector<128xf32>
    %34 = vector.multi_reduction <add>, %33, %cst_17 [0] : vector<8x128xf32> to vector<128xf32>
    %35 = vector.shape_cast %34 : vector<128xf32> to vector<1x128xf32>
    %cst_18 = arith.constant 8.000000e+00 : f32
    %36 = vector.broadcast %cst_18 : f32 to vector<1x128xf32>
    %37 = arith.divf %35, %36 : vector<1x128xf32>
    %38 = arith.mulf %33, %33 : vector<8x128xf32>
    %cst_19 = arith.constant dense<0.000000e+00> : vector<128xf32>
    %39 = vector.multi_reduction <add>, %38, %cst_19 [0] : vector<8x128xf32> to vector<128xf32>
    %40 = vector.shape_cast %39 : vector<128xf32> to vector<1x128xf32>
    %cst_20 = arith.constant 8.000000e+00 : f32
    %41 = vector.broadcast %cst_20 : f32 to vector<1x128xf32>
    %42 = arith.divf %40, %41 : vector<1x128xf32>
    %43 = arith.mulf %37, %37 : vector<1x128xf32>
    %44 = arith.subf %42, %43 : vector<1x128xf32>
    %cst_21 = arith.constant 0.000000e+00 : f32
    %45 = vector.broadcast %cst_21 : f32 to vector<1x128xf32>
    %46 = arith.maximumf %44, %45 : vector<1x128xf32>
    %c0_22 = arith.constant 0 : index
    %c0_23 = arith.constant 0 : index
    %47 = vector.load %arg5[%c0_22, %c0_23] : memref<1x128xf32, #tpu.memory_space<vmem>>, vector<1x128xf32>
    %cst_24 = arith.constant 9.99999974E-6 : f32
    %48 = vector.broadcast %cst_24 : f32 to vector<1x128xf32>
    %49 = arith.addf %46, %48 : vector<1x128xf32>
    %50 = math.rsqrt %49 : vector<1x128xf32>
    %51 = arith.mulf %47, %50 : vector<1x128xf32>
    %c0_25 = arith.constant 0 : index
    %c0_26 = arith.constant 0 : index
    %52 = vector.load %arg6[%c0_25, %c0_26] : memref<1x128xf32, #tpu.memory_space<vmem>>, vector<1x128xf32>
    %53 = arith.mulf %37, %51 : vector<1x128xf32>
    %54 = arith.subf %52, %53 : vector<1x128xf32>
    %55 = vector.broadcast %51 : vector<1x128xf32> to vector<8x128xf32>
    %56 = arith.mulf %33, %55 : vector<8x128xf32>
    %57 = vector.broadcast %54 : vector<1x128xf32> to vector<8x128xf32>
    %58 = arith.addf %56, %57 : vector<8x128xf32>
    %cst_27 = arith.constant 0.000000e+00 : f32
    %59 = vector.broadcast %cst_27 : f32 to vector<8x128xf32>
    %60 = arith.maximumf %58, %59 : vector<8x128xf32>
    %c0_28 = arith.constant 0 : index
    %c0_29 = arith.constant 0 : index
    %61 = vector.load %arg7[%c0_28, %c0_29] : memref<8x128xf32, #tpu.memory_space<vmem>>, vector<8x128xf32>
    tpu.vector_store %arg7[%c0_28, %c0_29], %60 {strides = array<i32>} : memref<8x128xf32, #tpu.memory_space<vmem>>, vector<8x128xf32>,
    return
  }
}

module attributes {stable_mosaic.version = 11 : i64} {
  func.func @_final_linear_kernel(%arg0: i32, %arg1: memref<8x128xf32, #tpu.memory_space<vmem>>, %arg2: memref<128x128xbf16, #tpu.memory_space<vmem>>, %arg3: memref<1x128xf32, #tpu.memory_space<vmem>>, %arg4: memref<8x128xf32, #tpu.memory_space<vmem>>) attributes {dimension_semantics = [#tpu.dimension_semantics<parallel>], iteration_bounds = array<i64: 1>, scalar_prefetch = 0 : i64, scratch_operands = 0 : i64, tpu.core_type = #tpu.core_type<tc>, window_params = [{pipeline_mode = #tpu.pipeline_mode<synchronous>, transform_indices = @transform_0, window_bounds = array<i64: 8, 128>}, {transform_indices = @transform_1, window_bounds = array<i64: 128, 128>}, {transform_indices = @transform_2, window_bounds = array<i64: 1, 128>}, {transform_indices = @transform_3, window_bounds = array<i64: 8, 128>}]} {
    %c0 = arith.constant 0 : index
    %c0_0 = arith.constant 0 : index
    %0 = vector.load %arg1[%c0, %c0_0] : memref<8x128xf32, #tpu.memory_space<vmem>>, vector<8x128xf32>
    %1 = arith.truncf %0 : vector<8x128xf32> to vector<8x128xbf16>
    %c0_1 = arith.constant 0 : index
    %c0_2 = arith.constant 0 : index
    %2 = vector.load %arg2[%c0_1, %c0_2] : memref<128x128xbf16, #tpu.memory_space<vmem>>, vector<128x128xbf16>
    %cst = arith.constant dense<0.000000e+00> : vector<8x128xf32>
    %3 = tpu.matmul %1, %2, %cst {dimension_numbers = #tpu.dot_dimension_numbers<[1], [0], [0], [1], [0, 0, 1, 1], [], []>} : vector<8x128xbf16>, vector<128x128xbf16>, vector<8x128xf32> -> vector<8x128xf32>
    %c0_3 = arith.constant 0 : index
    %c0_4 = arith.constant 0 : index
    %4 = vector.load %arg3[%c0_3, %c0_4] : memref<1x128xf32, #tpu.memory_space<vmem>>, vector<1x128xf32>
    %5 = vector.broadcast %4 : vector<1x128xf32> to vector<8x128xf32>
    %6 = arith.addf %3, %5 : vector<8x128xf32>
    %c0_5 = arith.constant 0 : index
    %c0_6 = arith.constant 0 : index
    %7 = vector.load %arg4[%c0_5, %c0_6] : memref<8x128xf32, #tpu.memory_space<vmem>>, vector<8x128xf32>
    tpu.vector_store %arg4[%c0_5, %c0_6], %6 {strides = array<i32>} : memref<8x128xf32, #tpu.memory_space<vmem>>, vector<8x128xf32>,
    return
  }
  func.func @transform_0(%arg0: i32) -> (i32, i32) {
    %c0_i32 = arith.constant 0 : i32
    %c0_i32_0 = arith.constant 0 : i32
    %c0_i32_1 = arith.constant 0 : i32
    return %c0_i32, %c0_i32_0 : i32, i32
  }
  func.func @transform_1(%arg0: i32) -> (i32, i32) {
    %c0_i32 = arith.constant 0 : i32
    %c0_i32_0 = arith.constant 0 : i32
    return %c0_i32, %arg0 : i32, i32
  }
  func.func @transform_2(%arg0: i32) -> (i32, i32) {
    %c0_i32 = arith.constant 0 : i32
    %c0_i32_0 = arith.constant 0 : i32
    return %c0_i32, %arg0 : i32, i32
  }
  func.func @transform_3(%arg0: i32) -> (i32, i32) {
    %c0_i32 = arith.constant 0 : i32
    %c0_i32_0 = arith.constant 0 : i32
    return %c0_i32, %arg0 : i32, i32
  }
}

</mosaic_0001>

<bundles_post_ra>
// kernel: a_call__.2
= control target key start
LH: loop header
LB: loop body
LE: loop exit
PB: predicated region body
PF: predicated region fallthrough
CT: control target
= control target key end

     0   :  { %12 = vsyncpa [#allocation3], 0  ;;  %s590_s0 = inlined_call_operand.vmem [shape: f32[8,128], index: 0, kind: input, shape index: {}]   ;;  %s591_s1 = inlined_call_operand.hbm [shape: bf16[128,128], index: 1, kind: input, shape index: {}]   ;;  %s592_s2 = inlined_call_operand.vmem [shape: f32[1,128], index: 2, kind: input, shape index: {}, may-alias: {2,5}]   ;;  %s593_s3 = inlined_call_operand.vmem [shape: f32[1,128], index: 3, kind: input, shape index: {}, may-alias: {3,6}]   ;;  %s594_s4 = inlined_call_operand.hbm [shape: bf16[128,128], index: 4, kind: input, shape index: {}]   ;;  %s595_s5 = inlined_call_operand.vmem [shape: f32[1,128], index: 5, kind: input, shape index: {}, may-alias: {2,5}]   ;;  %s596_s6 = inlined_call_operand.vmem [shape: f32[1,128], index: 6, kind: input, shape index: {}, may-alias: {3,6}]   ;;  %s597_s7 = inlined_call_operand.vmem [shape: f32[8,128], index: 7, kind: output, shape index: {}]  }
   0x1   :  { %13 = vsyncpa [#allocation5], 0  ;;  %s502_s24 = smov [#allocation2]   ;;  %s454_s28 = scalar_lea.hbm %s591_s1, 1024 }
   0x2   :  { %s21_s25 = sshll.u32 %s502_s24, 4  ;;  %p455_p0 = scmp.ne.s32.totalorder %s591_s1, %s454_s28  ;;  %s22_s25 = int_to_ptr.vmem [resolvable:$true] %s21_s25 }
   0x3   :  { %p458_p1 = scmp.lt.u32.totalorder %s454_s28, %s591_s1 }
   0x5   :  { %p460_p2 = pnand %p458_p1, %p455_p0 }
   0x7   :  { %463 = shalt.err (!%p460_p2)
}
   0x8   :  { %s464_s10 = scalar_lea.vmem %s22_s25, 1024  ;;  %p469_p4 = scmp.lt.s32.totalorder %s22_s25, %s22_s25 }
   0x9   :  { %p465_p3 = scmp.ne.s32.totalorder %s22_s25, %s464_s10  ;;  %p470_p5 = scmp.lt.s32.totalorder %s464_s10, %s464_s10 }
   0xb   :  { %p471_p6 = por %p470_p5, %p469_p4 }
   0xd   :  { %p472_p7 = pnand %p471_p6, %p465_p3 }
   0xf   :  { %475 = shalt.err (!%p472_p7)
}
  0x10   :  { %s503_s11 = smov 64   ;;  %s504_s12 = smov 4  }
  0x11   :  { %27 = dma.hbm_to_vmem [thread:$0]  %s591_s1, 1024, %s22_s25, [#allocation3], %s503_s11, %s503_s11, %s504_s12  }
  0x12   :  { %s505_s15 = smov [#allocation4]   ;;  %s476_s19 = scalar_lea.hbm %s594_s4, 1024 }
  0x13   :  { %s37_s16 = sshll.u32 %s505_s15, 4  ;;  %p477_p8 = scmp.ne.s32.totalorder %s594_s4, %s476_s19  ;;  %s38_s16 = int_to_ptr.vmem [resolvable:$true] %s37_s16 }
  0x14   :  { %p480_p9 = scmp.lt.u32.totalorder %s476_s19, %s594_s4 }
  0x16   :  { %p482_p10 = pnand %p480_p9, %p477_p8 }
  0x18   :  { %485 = shalt.err (!%p482_p10)
}
  0x19   :  { %s486_s24 = scalar_lea.vmem %s38_s16, 1024  ;;  %p491_p12 = scmp.lt.s32.totalorder %s38_s16, %s38_s16 }
  0x1a   :  { %p487_p11 = scmp.ne.s32.totalorder %s38_s16, %s486_s24  ;;  %p492_p13 = scmp.lt.s32.totalorder %s486_s24, %s486_s24 }
  0x1c   :  { %p493_p0 = por %p492_p13, %p491_p12 }
  0x1e   :  { %p494_p1 = pnand %p493_p0, %p487_p11 }
  0x20   :  { %497 = shalt.err (!%p494_p1)
}
  0x21   :  { %43 = dma.hbm_to_vmem [thread:$0]  %s594_s4, 1024, %s38_s16, [#allocation5], %s503_s11, %s503_s11, %s504_s12  }
  0x22   :  { %498 = dma.done.wait [#allocation3], 1024  }
  0x23   :  { %499 = vsyncadd [#allocation3], 4294966272 }
  0x24   :  { %500 = dma.done.wait [#allocation5], 1024  }
  0x25   :  { %501 = vsyncadd [#allocation5], 4294966272  ;;  %v506_v0 = vmov 0.0   ;;  %vm507_vm0 = vmmov 0   ;;  %v434_v1 = vld [vmem:[#allocation2] sm:$0xff]   ;;  %v435_v2 = vld [vmem:[#allocation2 + $0x8] sm:$0xff]   ;;  %v188_v42 = vlaneseq }
  0x26   :  { %388 = vmatprep.subr.bf16.mxu0 %v506_v0  ;;  %404 = vmatprep.mubr.msk.bf16.mxu0 %vm507_vm0, %v506_v0  ;;  %v436_v3 = vld [vmem:[#allocation2 + $0x10] sm:$0xff]   ;;  %v437_v4 = vld [vmem:[#allocation2 + $0x18] sm:$0xff]   ;;  %v438_v5 = vld [vmem:[#allocation2 + $0x20] sm:$0xff]  }
  0x27   :  { %408 = vmatprep.subr.bf16.mxu1 %v506_v0  ;;  %424 = vmatprep.mubr.msk.bf16.mxu1 %vm507_vm0, %v506_v0  ;;  %v439_v6 = vld [vmem:[#allocation2 + $0x28] sm:$0xff]   ;;  %v440_v7 = vld [vmem:[#allocation2 + $0x30] sm:$0xff]   ;;  %v441_v8 = vld [vmem:[#allocation2 + $0x38] sm:$0xff]   ;;  %v189_v43 = vshrl.u32 %v188_v42, 7 }
  0x28   :  { %389 = vmatpush3.bf16.msra.mxu0 %v434_v1  ;;  %v55_v9 = vld [vmem:[%s590_s0] sm:$0xff]  ;;  %v443_v12 = vld [vmem:[#allocation4 + $0x8] sm:$0xff]   ;;  %v444_v13 = vld [vmem:[#allocation4 + $0x10] sm:$0xff]  }
  0x29   :  { %390 = vmatprep.subr.bf16.mxu0 %v506_v0  ;;  %v56_v10 = vpack.c.bf16 %v55_v9, %v55_v9  ;;  %v442_v11 = vld [vmem:[#allocation4] sm:$0xff]   ;;  %v445_v14 = vld [vmem:[#allocation4 + $0x18] sm:$0xff]   ;;  %v447_v16 = vld [vmem:[#allocation4 + $0x28] sm:$0xff]   ;;  %v190_v45 = vsub.s32 0, %v189_v43 }
  0x2a   :  { %409 = vmatpush3.bf16.msra.mxu1 %v442_v11  ;;  %v446_v15 = vld [vmem:[#allocation4 + $0x20] sm:$0xff]   ;;  %v448_v17 = vld [vmem:[#allocation4 + $0x30] sm:$0xff]   ;;  %v449_v18 = vld [vmem:[#allocation4 + $0x38] sm:$0xff]  }
  0x2b   :  { %410 = vmatprep.subr.bf16.mxu1 %v506_v0  ;;  %v180_v44 = vld [vmem:[%s592_s2] sm:$0x1] }
  0x2c   :  { %391 = vmatpush3.bf16.msra.mxu0 %v435_v2  ;;  %v184_v48 = vld [vmem:[%s593_s3] sm:$0x1] }
  0x2d   :  { %392 = vmatprep.subr.bf16.mxu0 %v506_v0 }
  0x2e   :  { %411 = vmatpush3.bf16.msra.mxu1 %v443_v12 }
  0x2f   :  { %412 = vmatprep.subr.bf16.mxu1 %v506_v0 }
  0x30   :  { %393 = vmatpush3.bf16.msra.mxu0 %v436_v3 }
  0x31   :  { %394 = vmatprep.subr.bf16.mxu0 %v506_v0 }
  0x32   :  { %413 = vmatpush3.bf16.msra.mxu1 %v444_v13 }
  0x33   :  { %414 = vmatprep.subr.bf16.mxu1 %v506_v0 }
  0x34   :  { %395 = vmatpush3.bf16.msra.mxu0 %v437_v4 }
  0x35   :  { %396 = vmatprep.subr.bf16.mxu0 %v506_v0 }
  0x36   :  { %415 = vmatpush3.bf16.msra.mxu1 %v445_v14 }
  0x37   :  { %416 = vmatprep.subr.bf16.mxu1 %v506_v0 }
  0x38   :  { %397 = vmatpush3.bf16.msra.mxu0 %v438_v5 }
  0x39   :  { %398 = vmatprep.subr.bf16.mxu0 %v506_v0 }
  0x3a   :  { %417 = vmatpush3.bf16.msra.mxu1 %v446_v15 }
  0x3b   :  { %418 = vmatprep.subr.bf16.mxu1 %v506_v0 }
  0x3c   :  { %399 = vmatpush3.bf16.msra.mxu0 %v439_v6 }
  0x3d   :  { %400 = vmatprep.subr.bf16.mxu0 %v506_v0 }
  0x3e   :  { %419 = vmatpush3.bf16.msra.mxu1 %v447_v16  ;;  %v325_v16 = vld [vmem:[%s595_s5] sm:$0x1] }
  0x3f   :  { %420 = vmatprep.subr.bf16.mxu1 %v506_v0 }
  0x40   :  { %401 = vmatpush3.bf16.msra.mxu0 %v440_v7 }
  0x41   :  { %402 = vmatprep.subr.bf16.mxu0 %v506_v0 }
  0x42   :  { %421 = vmatpush3.bf16.msra.mxu1 %v448_v17 }
  0x43   :  { %422 = vmatprep.subr.bf16.mxu1 %v506_v0 }
  0x44   :  { %403 = vmatpush3.bf16.msra.mxu0 %v441_v8 }
  0x46   :  { %423 = vmatpush3.bf16.msra.mxu1 %v449_v18 }
  0x47   :  { %405 = vmatmul.mubr.bf16.vlgmr.msra.gmra.mrb[0].mxu0 %v56_v10 }
 0x11a   :  { %v155_v19 = vpop.f32.mrb[0].mxu0 }
 0x11b   :  { %v161_v20 = vrot.slane %v155_v19, 4  ;;  %v169_v21 = vmul.f32 %v155_v19, %v155_v19  ;;  %v406_v22 = vpop.f32.mrb[1].mxu0 }
 0x11c   :  { %v158_v23 = vpop.f32.mrb[2].mxu0 }
 0x11d   :  { %v162_v24 = vadd.f32 %v161_v20, %v155_v19  ;;  %v170_v25 = vrot.slane %v169_v21, 4  ;;  %v407_v26 = vpop.f32.mrb[3].mxu0 }
 0x11f   :  { %v163_v27 = vrot.slane %v162_v24, 2  ;;  %v171_v28 = vadd.f32 %v170_v25, %v169_v21 }
 0x121   :  { %v164_v29 = vadd.f32 %v163_v27, %v162_v24  ;;  %v172_v30 = vrot.slane %v171_v28, 2 }
 0x123   :  { %v165_v31 = vrot.slane %v164_v29, 1  ;;  %v173_v32 = vadd.f32 %v172_v30, %v171_v28 }
 0x125   :  { %v166_v33 = vadd.f32 %v165_v31, %v164_v29  ;;  %v174_v34 = vrot.slane %v173_v32, 1 }
 0x127   :  { %v168_v35 = vmul.f32 0.125, %v166_v33  ;;  %v175_v36 = vadd.f32 %v174_v34, %v173_v32 }
 0x129   :  { %v176_v37 = vmul.f32 0.125, %v175_v36  ;;  %v177_v38 = vmul.f32 %v168_v35, %v168_v35 }
 0x12b   :  { %v178_v39 = vsub.f32 %v176_v37, %v177_v38 }
 0x12d   :  { %v179_v40 = vmax.f32 %v178_v39, 0.0 }
 0x12f   :  { %v181_v41 = vadd.f32 1e-05, %v179_v40 }
 0x131   :  { %450 = vrsqrt.f32 %v181_v41 }
 0x13b   :  { %v451_v46 = vpop.eup %450 }
 0x13c   :  { %v183_v47 = vmul.f32 %v451_v46, %v180_v44 }
 0x13e   :  { %v191_v49 = vrot.slane %v183_v47, %v190_v45  ;;  %v185_v50 = vmul.f32 %v183_v47, %v168_v35 }
 0x140   :  { %v186_v51 = vsub.f32 %v184_v48, %v185_v50  ;;  %v193_v52 = vmul.f32 %v191_v49, %v155_v19  ;;  %v329_v19 = vld [vmem:[%s596_s6] sm:$0x1] }
 0x142   :  { %v198_v53 = vrot.slane %v186_v51, %v190_v45 }
 0x144   :  { %v200_v54 = vadd.f32 %v198_v53, %v193_v52 }
 0x146   :  { %v201_v55 = vmax.f32 %v200_v54, 0.0 }
 0x148   :  { %v202_v56 = vpack.c.bf16 %v201_v55, %v201_v55 }
 0x14a   :  { %425 = vmatmul.mubr.bf16.vlgmr.msra.gmra.mrb[0].mxu1 %v202_v56 }
 0x21d   :  { %v301_v57 = vpop.f32.mrb[0].mxu1 }
 0x21e   :  { %v307_v58 = vrot.slane %v301_v57, 4  ;;  %v314_v59 = vmul.f32 %v301_v57, %v301_v57  ;;  %v426_v60 = vpop.f32.mrb[1].mxu1 }
 0x21f   :  { %v304_v61 = vpop.f32.mrb[2].mxu1 }
 0x220   :  { %v308_v62 = vadd.f32 %v307_v58, %v301_v57  ;;  %v315_v63 = vrot.slane %v314_v59, 4  ;;  %v427_v0 = vpop.f32.mrb[3].mxu1 }
 0x222   :  { %v309_v1 = vrot.slane %v308_v62, 2  ;;  %v316_v2 = vadd.f32 %v315_v63, %v314_v59 }
 0x224   :  { %v310_v3 = vadd.f32 %v309_v1, %v308_v62  ;;  %v317_v4 = vrot.slane %v316_v2, 2 }
 0x226   :  { %v311_v5 = vrot.slane %v310_v3, 1  ;;  %v318_v6 = vadd.f32 %v317_v4, %v316_v2 }
 0x228   :  { %v312_v7 = vadd.f32 %v311_v5, %v310_v3  ;;  %v319_v8 = vrot.slane %v318_v6, 1 }
 0x22a   :  { %v313_v9 = vmul.f32 0.125, %v312_v7  ;;  %v320_v10 = vadd.f32 %v319_v8, %v318_v6 }
 0x22c   :  { %v321_v11 = vmul.f32 0.125, %v320_v10  ;;  %v322_v12 = vmul.f32 %v313_v9, %v313_v9 }
 0x22e   :  { %v323_v13 = vsub.f32 %v321_v11, %v322_v12 }
 0x230   :  { %v324_v14 = vmax.f32 %v323_v13, 0.0 }
 0x232   :  { %v326_v15 = vadd.f32 1e-05, %v324_v14 }
 0x234   :  { %452 = vrsqrt.f32 %v326_v15 }
 0x23e   :  { %v453_v17 = vpop.eup %452 }
 0x23f   :  { %v328_v18 = vmul.f32 %v453_v17, %v325_v16 }
 0x241   :  { %v330_v20 = vmul.f32 %v328_v18, %v313_v9  ;;  %v336_v21 = vrot.slane %v328_v18, %v190_v45 }
 0x243   :  { %v331_v22 = vsub.f32 %v329_v19, %v330_v20  ;;  %v338_v23 = vmul.f32 %v336_v21, %v301_v57 }
 0x245   :  { %v343_v24 = vrot.slane %v331_v22, %v190_v45 }
 0x247   :  { %v345_v25 = vadd.f32 %v343_v24, %v338_v23 }
 0x249   :  { %v346_v26 = vmax.f32 %v345_v25, 0.0 }
 0x24b   :  { %347 = vst [vmem:[%s597_s7] sm:$0xff] %v346_v26 }
 0x24c   :  { %352 = vsyncpa [#allocation3], 1 }
 0x24d   :  { %353 = vsyncpa [#allocation5], 1 }

// kernel: a_call__.3
= control target key start
LH: loop header
LB: loop body
LE: loop exit
PB: predicated region body
PF: predicated region fallthrough
CT: control target
= control target key end

     0   :  { %v217_v1 = vmov 0.0   ;;  %vm218_vm0 = vmmov 0   ;;  %s282_s0 = inlined_call_operand.vmem [shape: f32[8,128], index: 0, kind: input, shape index: {}]   ;;  %s283_s1 = inlined_call_operand.vmem [shape: bf16[128,128], index: 1, kind: input, shape index: {}]   ;;  %s284_s2 = inlined_call_operand.vmem [shape: f32[1,128], index: 2, kind: input, shape index: {}]   ;;  %s285_s3 = inlined_call_operand.hbm [shape: f32[8,128], index: 3, kind: output, shape index: {}]  }
   0x1   :  { %v185_v0 = vld [vmem:[%s283_s1] sm:$0xff]   ;;  %162 = vmatprep.subr.bf16.mxu0 %v217_v1  ;;  %v186_v2 = vld [vmem:[%s283_s1 + $0x8] sm:$0xff]   ;;  %178 = vmatprep.mubr.msk.bf16.mxu0 %vm218_vm0, %v217_v1  ;;  %v187_v3 = vld [vmem:[%s283_s1 + $0x10] sm:$0xff]  }
   0x2   :  { %163 = vmatpush3.bf16.msra.mxu0 %v185_v0 }
   0x3   :  { %164 = vmatprep.subr.bf16.mxu0 %v217_v1 }
   0x6   :  { %165 = vmatpush3.bf16.msra.mxu0 %v186_v2 }
   0x7   :  { %166 = vmatprep.subr.bf16.mxu0 %v217_v1 }
   0x8   :  { %8 = vsyncpa [#allocation3], 0  ;;  %v188_v4 = vld [vmem:[%s283_s1 + $0x18] sm:$0xff]   ;;  %v189_v5 = vld [vmem:[%s283_s1 + $0x20] sm:$0xff]   ;;  %s219_s5 = smov [#allocation2]  }
   0x9   :  { %v190_v6 = vld [vmem:[%s283_s1 + $0x28] sm:$0xff]   ;;  %v191_v7 = vld [vmem:[%s283_s1 + $0x30] sm:$0xff]   ;;  %v192_v8 = vld [vmem:[%s283_s1 + $0x38] sm:$0xff]   ;;  %s136_s6 = sshll.u32 %s219_s5, 4  ;;  %s137_s6 = int_to_ptr.vmem [resolvable:$true] %s136_s6 }
   0xa   :  { %167 = vmatpush3.bf16.msra.mxu0 %v187_v3  ;;  %v16_v9 = vld [vmem:[%s282_s0] sm:$0xff]  ;;  %s193_s1 = scalar_lea.vmem %s137_s6, 128  ;;  %p198_p1 = scmp.lt.s32.totalorder %s137_s6, %s137_s6 }
   0xb   :  { %168 = vmatprep.subr.bf16.mxu0 %v217_v1  ;;  %v17_v10 = vpack.c.bf16 %v16_v9, %v16_v9  ;;  %v144_v11 = vld [vmem:[%s284_s2] ss:$0 sm:$0xff]  ;;  %p194_p0 = scmp.ne.s32.totalorder %s137_s6, %s193_s1  ;;  %p199_p2 = scmp.lt.s32.totalorder %s193_s1, %s193_s1 }
   0xd   :  { %p200_p3 = por %p199_p2, %p198_p1 }
   0xe   :  { %169 = vmatpush3.bf16.msra.mxu0 %v188_v4 }
   0xf   :  { %170 = vmatprep.subr.bf16.mxu0 %v217_v1  ;;  %p201_p4 = pnand %p200_p3, %p194_p0 }
  0x12   :  { %171 = vmatpush3.bf16.msra.mxu0 %v189_v5 }
  0x13   :  { %172 = vmatprep.subr.bf16.mxu0 %v217_v1 }
  0x16   :  { %173 = vmatpush3.bf16.msra.mxu0 %v190_v6 }
  0x17   :  { %174 = vmatprep.subr.bf16.mxu0 %v217_v1 }
  0x1a   :  { %175 = vmatpush3.bf16.msra.mxu0 %v191_v7 }
  0x1b   :  { %176 = vmatprep.subr.bf16.mxu0 %v217_v1 }
  0x1e   :  { %177 = vmatpush3.bf16.msra.mxu0 %v192_v8 }
  0x21   :  { %179 = vmatmul.mubr.bf16.vlgmr.msra.gmra.mrb[0].mxu0 %v17_v10 }
  0xf4   :  { %v123_v12 = vpop.f32.mrb[0].mxu0 }
  0xf5   :  { %v124_v13 = vadd.f32 %v144_v11, %v123_v12  ;;  %v180_v14 = vpop.f32.mrb[1].mxu0 }
  0xf6   :  { %v126_v15 = vpop.f32.mrb[2].mxu0 }
  0xf7   :  { %129 = vst [vmem:[#allocation2] sm:$0xff] %v124_v13  ;;  %v181_v16 = vpop.f32.mrb[3].mxu0 }
  0xf8   :  { %204 = shalt.err (!%p201_p4)
}
  0xf9   :  { %s205_s2 = scalar_lea.hbm %s285_s3, 128 }
  0xfa   :  { %p206_p5 = scmp.ne.s32.totalorder %s285_s3, %s205_s2  ;;  %p209_p6 = scmp.lt.u32.totalorder %s205_s2, %s285_s3 }
  0xfc   :  { %p211_p7 = pnand %p209_p6, %p206_p5 }
  0xfe   :  { %214 = shalt.err (!%p211_p7)
}
  0xff   :  { %139 = dma.vmem_to_hbm [thread:$0]  %s137_s6, 128, %s285_s3, [#allocation3]  }
 0x100   :  { %215 = dma.done.wait [#allocation3], 128  }
 0x101   :  { %216 = vsyncadd [#allocation3], 4294967168 }
 0x102   :  { %143 = vsyncpa [#allocation3], 1 }

</bundles_post_ra>
